<compile_context>
chip_gen: v7x
topology: tpu7x:2x2x1
jax: 0.10.0
libtpu: 0.0.40
codegen_flags: <defaults>
</compile_context>

<pallas_src>
import math

import jax
import jax.numpy as jnp
from jax.experimental import pallas as pl
from jax.experimental.pallas import tpu as pltpu

BN_EPS = 1e-5
NUM_CLASSES = 10
PAD_CLASSES = 128          # lane-dense width for the final layer
IN_FEATURES = 28 * 28      # 784
NEG_INF_BIAS = -1e30       # bias for padded logit columns
MAX_TN = 1024              # upper bound on the feature-tile width


def pick_tile(dout, max_tn=MAX_TN):
    """Largest multiple-of-128 divisor of dout <= max_tn (640 for 3200).

    Falls back to a single full-extent tile when no such divisor exists.
    """
    best = None
    for tn in range(128, min(dout, max_tn) + 1, 128):
        if dout % tn == 0:
            best = tn
    return dout if best is None else best


# ---------------------------------------------------------------------------
# Kernels
# ---------------------------------------------------------------------------
def linear_bn_kernel(x_ref, w_ref, gb_ref, o_ref):
    """One Dout-tile of fused Linear (no bias) + BatchNorm1d (training stats).

    x_ref:  (B, Din)  bf16  (full activation, same block every tile)
    w_ref:  (Din, TN) bf16  (weight tile, streamed)
    gb_ref: (2, TN)   f32   (row 0 = gamma, row 1 = beta)
    o_ref:  (B, TN)   bf16
    """
    h = jnp.dot(x_ref[...], w_ref[...], preferred_element_type=jnp.float32)
    gb = gb_ref[...]
    mean = jnp.mean(h, axis=0, keepdims=True)
    c = h - mean                                   # two-pass variance (stable)
    var = jnp.mean(c * c, axis=0, keepdims=True)
    scale = gb[0:1, :] * jax.lax.rsqrt(var + BN_EPS)
    o_ref[...] = (c * scale + gb[1:2, :]).astype(o_ref.dtype)


def linear_bn_head_kernel(x_ref, w_ref, gb_ref, lw_ref, lb_ref, o_ref):
    """Last hidden layer (Linear+BN) fused with final Linear + log_softmax.

    x_ref:  (B, Din)           bf16 (resident)
    w_ref:  (Din, TN)          bf16 (hidden weight tile, streamed)
    gb_ref: (2, TN)            f32  (gamma / beta)
    lw_ref: (TN, PAD_CLASSES)  bf16 (final-layer weight rows for this tile)
    lb_ref: (1, PAD_CLASSES)   f32  (final bias; padded entries = -1e30)
    o_ref:  (B, PAD_CLASSES)   f32  (resident logits accumulator -> log-probs)
    """
    j = pl.program_id(0)

    @pl.when(j == 0)
    def _():
        o_ref[...] = jnp.zeros_like(o_ref)

    h = jnp.dot(x_ref[...], w_ref[...], preferred_element_type=jnp.float32)
    gb = gb_ref[...]
    mean = jnp.mean(h, axis=0, keepdims=True)
    c = h - mean
    var = jnp.mean(c * c, axis=0, keepdims=True)
    scale = gb[0:1, :] * jax.lax.rsqrt(var + BN_EPS)
    y = c * scale + gb[1:2, :]

    o_ref[...] += jnp.dot(y.astype(jnp.bfloat16), lw_ref[...],
                          preferred_element_type=jnp.float32)

    @pl.when(j == pl.num_programs(0) - 1)
    def _():
        logits = o_ref[...] + lb_ref[...]
        m = jnp.max(logits, axis=1, keepdims=True)
        s = logits - m
        lse = jnp.log(jnp.sum(jnp.exp(s), axis=1, keepdims=True))
        o_ref[...] = s - lse


# ---------------------------------------------------------------------------
# Wrappers
# ---------------------------------------------------------------------------
def linear_bn(x, w, gb):
    B, Din = x.shape
    Dout = w.shape[1]
    tn = pick_tile(Dout)
    grid = (Dout // tn,)
    return pl.pallas_call(
        linear_bn_kernel,
        out_shape=jax.ShapeDtypeStruct((B, Dout), jnp.bfloat16),
        grid=grid,
        in_specs=[
            pl.BlockSpec((B, Din), lambda j: (0, 0)),      # activation (resident)
            pl.BlockSpec((Din, tn), lambda j: (0, j)),     # weight tile (streamed)
            pl.BlockSpec((2, tn), lambda j: (0, j)),       # gamma/beta packed
        ],
        out_specs=pl.BlockSpec((B, tn), lambda j: (0, j)),
        compiler_params=pltpu.CompilerParams(
            dimension_semantics=("parallel",)),
    )(x, w, gb)


def linear_bn_head(x, w, gb, lw_pad, lb_pad):
    B, Din = x.shape
    Dout = w.shape[1]
    tn = pick_tile(Dout)
    grid = (Dout // tn,)
    out = pl.pallas_call(
        linear_bn_head_kernel,
        out_shape=jax.ShapeDtypeStruct((B, PAD_CLASSES), jnp.float32),
        grid=grid,
        in_specs=[
            pl.BlockSpec((B, Din), lambda j: (0, 0)),              # activation
            pl.BlockSpec((Din, tn), lambda j: (0, j)),             # hidden W tile
            pl.BlockSpec((2, tn), lambda j: (0, j)),               # gamma/beta
            pl.BlockSpec((tn, PAD_CLASSES), lambda j: (j, 0)),     # final W rows
            pl.BlockSpec((1, PAD_CLASSES), lambda j: (0, 0)),      # final bias
        ],
        out_specs=pl.BlockSpec((B, PAD_CLASSES), lambda j: (0, 0)),
        compiler_params=pltpu.CompilerParams(
            dimension_semantics=("arbitrary",)),   # output is an accumulator
    )(x, w, gb, lw_pad, lb_pad)
    return out[:, :NUM_CLASSES]


# ---------------------------------------------------------------------------
# Parameter init (PyTorch-Linear-style uniform bounds; weights stored bf16,
# transposed to (in_features, out_features)).  The hidden Linear bias is
# mathematically cancelled by training-mode BatchNorm, so it is not generated.
# The final layer is column-padded to 128 lane-dense classes.
# ---------------------------------------------------------------------------
def init_mlp_params(key, sizes, in_features=IN_FEATURES, n_classes=NUM_CLASSES):
    assert len(sizes) >= 1
    params = {"hidden": []}
    d_in = in_features
    for size in sizes:
        key, kw = jax.random.split(key)
        bound = 1.0 / math.sqrt(d_in)
        w = jax.random.uniform(kw, (d_in, size), jnp.float32, -bound, bound)
        gamma = jnp.ones((1, size), jnp.float32)   # BatchNorm1d weight init
        beta = jnp.zeros((1, size), jnp.float32)   # BatchNorm1d bias init
        gb = jnp.concatenate([gamma, beta], axis=0)            # (2, size)
        params["hidden"].append((w.astype(jnp.bfloat16), gb))
        d_in = size

    key, kw, kb = jax.random.split(key, 3)
    bound = 1.0 / math.sqrt(d_in)
    last_w = jax.random.uniform(kw, (d_in, n_classes), jnp.float32,
                                -bound, bound)
    last_b = jax.random.uniform(kb, (1, n_classes), jnp.float32,
                                -bound, bound)
    last_w = jnp.pad(last_w, ((0, 0), (0, PAD_CLASSES - n_classes)))
    last_b = jnp.pad(last_b, ((0, 0), (0, PAD_CLASSES - n_classes)),
                     constant_values=NEG_INF_BIAS)
    params["last_w"] = last_w.astype(jnp.bfloat16)
    params["last_b"] = last_b
    return params


def mlp_forward(params, x_nchw):
    # (B, 1, 28, 28) -> (B, 784), same as input.view(-1, 28*28); cast once to
    # bf16 (all matmuls are bf16 x bf16 -> f32 accumulation).
    B = x_nchw.shape[0]
    x = x_nchw.reshape(B, IN_FEATURES).astype(jnp.bfloat16)
    hidden = params["hidden"]
    for (w, gb) in hidden[:-1]:
        x = linear_bn(x, w, gb)
    w, gb = hidden[-1]
    # Last hidden layer fused with the final Linear + log_softmax.
    return linear_bn_head(x, w, gb, params["last_w"], params["last_b"])


def reference_forward(params, x_nchw):
    """Pure-JAX f32 reference (same math as the PyTorch module)."""
    B = x_nchw.shape[0]
    x = x_nchw.reshape(B, IN_FEATURES).astype(jnp.float32)
    for (w, gb) in params["hidden"]:
        h = x @ w.astype(jnp.float32)
        mean = jnp.mean(h, axis=0, keepdims=True)
        var = jnp.mean((h - mean) ** 2, axis=0, keepdims=True)
        x = gb[0:1] * (h - mean) * jax.lax.rsqrt(var + BN_EPS) + gb[1:2]
    logits = (x @ params["last_w"].astype(jnp.float32)[:, :NUM_CLASSES]
              + params["last_b"][:, :NUM_CLASSES])
    return jax.nn.log_softmax(logits, axis=1)


# ---------------------------------------------------------------------------
if __name__ == "__main__":
    key = jax.random.PRNGKey(0)
    kx, kp = jax.random.split(key)

    # Small smoke-test configuration (module default is sizes=[3200]); two
    # hidden layers so both the tiled hidden kernel and the fused head run.
    sizes = [256, 128]
    B = 8
    x = jax.random.normal(kx, (B, 1, 28, 28), jnp.float32)
    params = init_mlp_params(kp, sizes)

    fwd = jax.jit(mlp_forward)
    out = jax.block_until_ready(fwd(params, x))

    assert out.shape == (B, NUM_CLASSES)
    assert bool(jnp.all(jnp.isfinite(out)))
    # log_softmax rows must (numerically) exponentiate-and-sum to ~1
    row_sums = jnp.sum(jnp.exp(out), axis=1)
    assert bool(jnp.allclose(row_sums, 1.0, atol=1e-3))
    # loose check against the f32 reference (bf16 matmul inputs -> ~1e-2 level)
    ref = reference_forward(params, x)
    assert bool(jnp.allclose(out, ref, atol=1e-1, rtol=1e-1))
    print("KERNEL_OK")
</pallas_src>

<mosaic_0001>
module attributes {stable_mosaic.version = 11 : i64} {
  func.func @linear_bn_head_kernel(%arg0: i32, %arg1: memref<8x256xbf16, #tpu.memory_space<vmem>>, %arg2: memref<256x128xbf16, #tpu.memory_space<vmem>>, %arg3: memref<2x128xf32, #tpu.memory_space<vmem>>, %arg4: memref<128x128xbf16, #tpu.memory_space<vmem>>, %arg5: memref<1x128xf32, #tpu.memory_space<vmem>>, %arg6: memref<8x128xf32, #tpu.memory_space<vmem>>) attributes {dimension_semantics = [#tpu.dimension_semantics<arbitrary>], iteration_bounds = array<i64: 1>, scalar_prefetch = 0 : i64, scratch_operands = 0 : i64, tpu.core_type = #tpu.core_type<tc>, window_params = [{pipeline_mode = #tpu.pipeline_mode<synchronous>, transform_indices = @transform_0, window_bounds = array<i64: 8, 256>}, {transform_indices = @transform_1, window_bounds = array<i64: 256, 128>}, {transform_indices = @transform_2, window_bounds = array<i64: 2, 128>}, {transform_indices = @transform_3, window_bounds = array<i64: 128, 128>}, {pipeline_mode = #tpu.pipeline_mode<synchronous>, transform_indices = @transform_4, window_bounds = array<i64: 1, 128>}, {pipeline_mode = #tpu.pipeline_mode<synchronous>, transform_indices = @transform_5, window_bounds = array<i64: 8, 128>}]} {
    %c0_i32 = arith.constant 0 : i32
    %0 = arith.cmpi eq, %arg0, %c0_i32 : i32
    %1 = arith.extui %0 : i1 to i32
    %c0_i32_0 = arith.constant 0 : i32
    %2 = arith.cmpi ne, %1, %c0_i32_0 : i32
    scf.if %2 {
      %cst_20 = arith.constant 0.000000e+00 : f32
      %37 = vector.broadcast %cst_20 : f32 to vector<8x128xf32>
      %c0_21 = arith.constant 0 : index
      %c0_22 = arith.constant 0 : index
      %38 = vector.load %arg6[%c0_21, %c0_22] : memref<8x128xf32, #tpu.memory_space<vmem>>, vector<8x128xf32>
      tpu.vector_store %arg6[%c0_21, %c0_22], %37 {strides = array<i32>} : memref<8x128xf32, #tpu.memory_space<vmem>>, vector<8x128xf32>,
    } else {
    }
    %c0 = arith.constant 0 : index
    %c0_1 = arith.constant 0 : index
    %3 = vector.load %arg1[%c0, %c0_1] : memref<8x256xbf16, #tpu.memory_space<vmem>>, vector<8x256xbf16>
    %c0_2 = arith.constant 0 : index
    %c0_3 = arith.constant 0 : index
    %4 = vector.load %arg2[%c0_2, %c0_3] : memref<256x128xbf16, #tpu.memory_space<vmem>>, vector<256x128xbf16>
    %cst = arith.constant dense<0.000000e+00> : vector<8x128xf32>
    %5 = tpu.matmul %3, %4, %cst {dimension_numbers = #tpu.dot_dimension_numbers<[1], [0], [0], [1], [0, 0, 1, 1], [], []>} : vector<8x256xbf16>, vector<256x128xbf16>, vector<8x128xf32> -> vector<8x128xf32>
    %c0_4 = arith.constant 0 : index
    %c0_5 = arith.constant 0 : index
    %6 = vector.load %arg3[%c0_4, %c0_5] : memref<2x128xf32, #tpu.memory_space<vmem>>, vector<2x128xf32>
    %cst_6 = arith.constant dense<0.000000e+00> : vector<128xf32>
    %7 = vector.multi_reduction <add>, %5, %cst_6 [0] : vector<8x128xf32> to vector<128xf32>
    %8 = vector.shape_cast %7 : vector<128xf32> to vector<1x128xf32>
    %cst_7 = arith.constant 8.000000e+00 : f32
    %9 = vector.broadcast %cst_7 : f32 to vector<1x128xf32>
    %10 = arith.divf %8, %9 : vector<1x128xf32>
    %11 = vector.broadcast %10 : vector<1x128xf32> to vector<8x128xf32>
    %12 = arith.subf %5, %11 : vector<8x128xf32>
    %13 = arith.mulf %12, %12 : vector<8x128xf32>
    %cst_8 = arith.constant dense<0.000000e+00> : vector<128xf32>
    %14 = vector.multi_reduction <add>, %13, %cst_8 [0] : vector<8x128xf32> to vector<128xf32>
    %15 = vector.shape_cast %14 : vector<128xf32> to vector<1x128xf32>
    %cst_9 = arith.constant 8.000000e+00 : f32
    %16 = vector.broadcast %cst_9 : f32 to vector<1x128xf32>
    %17 = arith.divf %15, %16 : vector<1x128xf32>
    %18 = vector.extract_strided_slice %6 {offsets = [0, 0], sizes = [1, 128], strides = [1, 1]} : vector<2x128xf32> to vector<1x128xf32>
    %cst_10 = arith.constant 9.99999974E-6 : f32
    %19 = vector.broadcast %cst_10 : f32 to vector<1x128xf32>
    %20 = arith.addf %17, %19 : vector<1x128xf32>
    %21 = math.rsqrt %20 : vector<1x128xf32>
    %22 = arith.mulf %18, %21 : vector<1x128xf32>
    %23 = vector.broadcast %22 : vector<1x128xf32> to vector<8x128xf32>
    %24 = arith.mulf %12, %23 : vector<8x128xf32>
    %25 = vector.extract_strided_slice %6 {offsets = [1, 0], sizes = [1, 128], strides = [1, 1]} : vector<2x128xf32> to vector<1x128xf32>
    %26 = vector.broadcast %25 : vector<1x128xf32> to vector<8x128xf32>
    %27 = arith.addf %24, %26 : vector<8x128xf32>
    %c0_11 = arith.constant 0 : index
    %c0_12 = arith.constant 0 : index
    %28 = vector.load %arg6[%c0_11, %c0_12] : memref<8x128xf32, #tpu.memory_space<vmem>>, vector<8x128xf32>
    %29 = arith.truncf %27 : vector<8x128xf32> to vector<8x128xbf16>
    %c0_13 = arith.constant 0 : index
    %c0_14 = arith.constant 0 : index
    %30 = vector.load %arg4[%c0_13, %c0_14] : memref<128x128xbf16, #tpu.memory_space<vmem>>, vector<128x128xbf16>
    %cst_15 = arith.constant dense<0.000000e+00> : vector<8x128xf32>
    %31 = tpu.matmul %29, %30, %cst_15 {dimension_numbers = #tpu.dot_dimension_numbers<[1], [0], [0], [1], [0, 0, 1, 1], [], []>} : vector<8x128xbf16>, vector<128x128xbf16>, vector<8x128xf32> -> vector<8x128xf32>
    %32 = arith.addf %28, %31 : vector<8x128xf32>
    %c0_16 = arith.constant 0 : index
    %c0_17 = arith.constant 0 : index
    %33 = vector.load %arg6[%c0_16, %c0_17] : memref<8x128xf32, #tpu.memory_space<vmem>>, vector<8x128xf32>
    tpu.vector_store %arg6[%c0_16, %c0_17], %32 {strides = array<i32>} : memref<8x128xf32, #tpu.memory_space<vmem>>, vector<8x128xf32>,
    %c0_i32_18 = arith.constant 0 : i32
    %34 = arith.cmpi eq, %arg0, %c0_i32_18 : i32
    %35 = arith.extui %34 : i1 to i32
    %c0_i32_19 = arith.constant 0 : i32
    %36 = arith.cmpi ne, %35, %c0_i32_19 : i32
    scf.if %36 {
      %c0_20 = arith.constant 0 : index
      %c0_21 = arith.constant 0 : index
      %37 = vector.load %arg6[%c0_20, %c0_21] : memref<8x128xf32, #tpu.memory_space<vmem>>, vector<8x128xf32>
      %c0_22 = arith.constant 0 : index
      %c0_23 = arith.constant 0 : index
      %38 = vector.load %arg5[%c0_22, %c0_23] : memref<1x128xf32, #tpu.memory_space<vmem>>, vector<1x128xf32>
      %39 = vector.broadcast %38 : vector<1x128xf32> to vector<8x128xf32>
      %40 = arith.addf %37, %39 : vector<8x128xf32>
      %cst_24 = arith.constant dense<0xFF800000> : vector<8xf32>
      %41 = vector.multi_reduction <maximumf>, %40, %cst_24 [1] : vector<8x128xf32> to vector<8xf32>
      %42 = vector.shape_cast %41 : vector<8xf32> to vector<8x1xf32>
      %43 = vector.broadcast %42 : vector<8x1xf32> to vector<8x128xf32>
      %44 = arith.subf %40, %43 : vector<8x128xf32>
      %45 = math.exp %44 : vector<8x128xf32>
      %cst_25 = arith.constant dense<0.000000e+00> : vector<8xf32>
      %46 = vector.multi_reduction <add>, %45, %cst_25 [1] : vector<8x128xf32> to vector<8xf32>
      %47 = vector.shape_cast %46 : vector<8xf32> to vector<8x1xf32>
      %48 = math.log %47 : vector<8x1xf32>
      %49 = vector.broadcast %48 : vector<8x1xf32> to vector<8x128xf32>
      %50 = arith.subf %44, %49 : vector<8x128xf32>
      %c0_26 = arith.constant 0 : index
      %c0_27 = arith.constant 0 : index
      %51 = vector.load %arg6[%c0_26, %c0_27] : memref<8x128xf32, #tpu.memory_space<vmem>>, vector<8x128xf32>
      tpu.vector_store %arg6[%c0_26, %c0_27], %50 {strides = array<i32>} : memref<8x128xf32, #tpu.memory_space<vmem>>, vector<8x128xf32>,
    } else {
    }
    return
  }
  func.func @transform_0(%arg0: i32) -> (i32, i32) {
    %c0_i32 = arith.constant 0 : i32
    %c0_i32_0 = arith.constant 0 : i32
    %c0_i32_1 = arith.constant 0 : i32
    return %c0_i32, %c0_i32_0 : i32, i32
  }
  func.func @transform_1(%arg0: i32) -> (i32, i32) {
    %c0_i32 = arith.constant 0 : i32
    %c0_i32_0 = arith.constant 0 : i32
    return %c0_i32, %arg0 : i32, i32
  }
  func.func @transform_2(%arg0: i32) -> (i32, i32) {
    %c0_i32 = arith.constant 0 : i32
    %c0_i32_0 = arith.constant 0 : i32
    return %c0_i32, %arg0 : i32, i32
  }
  func.func @transform_3(%arg0: i32) -> (i32, i32) {
    %c0_i32 = arith.constant 0 : i32
    %c0_i32_0 = arith.constant 0 : i32
    return %arg0, %c0_i32 : i32, i32
  }
  func.func @transform_4(%arg0: i32) -> (i32, i32) {
    %c0_i32 = arith.constant 0 : i32
    %c0_i32_0 = arith.constant 0 : i32
    %c0_i32_1 = arith.constant 0 : i32
    return %c0_i32, %c0_i32_0 : i32, i32
  }
  func.func @transform_5(%arg0: i32) -> (i32, i32) {
    %c0_i32 = arith.constant 0 : i32
    %c0_i32_0 = arith.constant 0 : i32
    %c0_i32_1 = arith.constant 0 : i32
    return %c0_i32, %c0_i32_0 : i32, i32
  }
}

module attributes {stable_mosaic.version = 11 : i64} {
  func.func @linear_bn_kernel(%arg0: i32, %arg1: memref<8x784xbf16, #tpu.memory_space<vmem>>, %arg2: memref<784x256xbf16, #tpu.memory_space<vmem>>, %arg3: memref<2x256xf32, #tpu.memory_space<vmem>>, %arg4: memref<8x256xbf16, #tpu.memory_space<vmem>>) attributes {dimension_semantics = [#tpu.dimension_semantics<parallel>], iteration_bounds = array<i64: 1>, scalar_prefetch = 0 : i64, scratch_operands = 0 : i64, tpu.core_type = #tpu.core_type<tc>, window_params = [{pipeline_mode = #tpu.pipeline_mode<synchronous>, transform_indices = @transform_0, window_bounds = array<i64: 8, 784>}, {transform_indices = @transform_1, window_bounds = array<i64: 784, 256>}, {transform_indices = @transform_2, window_bounds = array<i64: 2, 256>}, {transform_indices = @transform_3, window_bounds = array<i64: 8, 256>}]} {
    %c0 = arith.constant 0 : index
    %c0_0 = arith.constant 0 : index
    %0 = vector.load %arg1[%c0, %c0_0] : memref<8x784xbf16, #tpu.memory_space<vmem>>, vector<8x784xbf16>
    %c0_1 = arith.constant 0 : index
    %c0_2 = arith.constant 0 : index
    %1 = vector.load %arg2[%c0_1, %c0_2] : memref<784x256xbf16, #tpu.memory_space<vmem>>, vector<784x256xbf16>
    %cst = arith.constant dense<0.000000e+00> : vector<8x256xf32>
    %2 = tpu.matmul %0, %1, %cst {dimension_numbers = #tpu.dot_dimension_numbers<[1], [0], [0], [1], [0, 0, 1, 1], [], []>} : vector<8x784xbf16>, vector<784x256xbf16>, vector<8x256xf32> -> vector<8x256xf32>
    %c0_3 = arith.constant 0 : index
    %c0_4 = arith.constant 0 : index
    %3 = vector.load %arg3[%c0_3, %c0_4] : memref<2x256xf32, #tpu.memory_space<vmem>>, vector<2x256xf32>
    %cst_5 = arith.constant dense<0.000000e+00> : vector<256xf32>
    %4 = vector.multi_reduction <add>, %2, %cst_5 [0] : vector<8x256xf32> to vector<256xf32>
    %5 = vector.shape_cast %4 : vector<256xf32> to vector<1x256xf32>
    %cst_6 = arith.constant 8.000000e+00 : f32
    %6 = vector.broadcast %cst_6 : f32 to vector<1x256xf32>
    %7 = arith.divf %5, %6 : vector<1x256xf32>
    %8 = vector.broadcast %7 : vector<1x256xf32> to vector<8x256xf32>
    %9 = arith.subf %2, %8 : vector<8x256xf32>
    %10 = arith.mulf %9, %9 : vector<8x256xf32>
    %cst_7 = arith.constant dense<0.000000e+00> : vector<256xf32>
    %11 = vector.multi_reduction <add>, %10, %cst_7 [0] : vector<8x256xf32> to vector<256xf32>
    %12 = vector.shape_cast %11 : vector<256xf32> to vector<1x256xf32>
    %cst_8 = arith.constant 8.000000e+00 : f32
    %13 = vector.broadcast %cst_8 : f32 to vector<1x256xf32>
    %14 = arith.divf %12, %13 : vector<1x256xf32>
    %15 = vector.extract_strided_slice %3 {offsets = [0, 0], sizes = [1, 256], strides = [1, 1]} : vector<2x256xf32> to vector<1x256xf32>
    %cst_9 = arith.constant 9.99999974E-6 : f32
    %16 = vector.broadcast %cst_9 : f32 to vector<1x256xf32>
    %17 = arith.addf %14, %16 : vector<1x256xf32>
    %18 = math.rsqrt %17 : vector<1x256xf32>
    %19 = arith.mulf %15, %18 : vector<1x256xf32>
    %20 = vector.broadcast %19 : vector<1x256xf32> to vector<8x256xf32>
    %21 = arith.mulf %9, %20 : vector<8x256xf32>
    %22 = vector.extract_strided_slice %3 {offsets = [1, 0], sizes = [1, 256], strides = [1, 1]} : vector<2x256xf32> to vector<1x256xf32>
    %23 = vector.broadcast %22 : vector<1x256xf32> to vector<8x256xf32>
    %24 = arith.addf %21, %23 : vector<8x256xf32>
    %25 = arith.truncf %24 : vector<8x256xf32> to vector<8x256xbf16>
    %c0_10 = arith.constant 0 : index
    %c0_11 = arith.constant 0 : index
    %26 = vector.load %arg4[%c0_10, %c0_11] : memref<8x256xbf16, #tpu.memory_space<vmem>>, vector<8x256xbf16>
    tpu.vector_store %arg4[%c0_10, %c0_11], %25 {strides = array<i32>} : memref<8x256xbf16, #tpu.memory_space<vmem>>, vector<8x256xbf16>,
    return
  }
  func.func @transform_0(%arg0: i32) -> (i32, i32) {
    %c0_i32 = arith.constant 0 : i32
    %c0_i32_0 = arith.constant 0 : i32
    %c0_i32_1 = arith.constant 0 : i32
    return %c0_i32, %c0_i32_0 : i32, i32
  }
  func.func @transform_1(%arg0: i32) -> (i32, i32) {
    %c0_i32 = arith.constant 0 : i32
    %c0_i32_0 = arith.constant 0 : i32
    return %c0_i32, %arg0 : i32, i32
  }
  func.func @transform_2(%arg0: i32) -> (i32, i32) {
    %c0_i32 = arith.constant 0 : i32
    %c0_i32_0 = arith.constant 0 : i32
    return %c0_i32, %arg0 : i32, i32
  }
  func.func @transform_3(%arg0: i32) -> (i32, i32) {
    %c0_i32 = arith.constant 0 : i32
    %c0_i32_0 = arith.constant 0 : i32
    return %c0_i32, %arg0 : i32, i32
  }
}

</mosaic_0001>

<bundles_post_ra>
// kernel: mlp_forward.3
= control target key start
LH: loop header
LB: loop body
LE: loop exit
PB: predicated region body
PF: predicated region fallthrough
CT: control target
= control target key end

     0   :  { %s642_s0 = inlined_call_operand.vmem [shape: bf16[8,256], index: 0, kind: input, shape index: {}]   ;;  %s643_s1 = inlined_call_operand.vmem [shape: bf16[256,128], index: 1, kind: input, shape index: {}]   ;;  %s644_s2 = inlined_call_operand.vmem [shape: f32[2,128], index: 2, kind: input, shape index: {}]   ;;  %s645_s3 = inlined_call_operand.vmem [shape: bf16[128,128], index: 3, kind: input, shape index: {}]   ;;  %s646_s4 = inlined_call_operand.vmem [shape: f32[1,128], index: 4, kind: input, shape index: {}]   ;;  %s647_s5 = inlined_call_operand.hbm [shape: f32[8,128], index: 5, kind: output, shape index: {}]  }
   0x1   :  { %v460_v0 = vld [vmem:[%s643_s1 + $0x40] sm:$0xff]   ;;  %v462_v2 = vld [vmem:[%s643_s1 + $0x48] sm:$0xff]   ;;  %v464_v4 = vld [vmem:[%s643_s1 + $0x50] sm:$0xff]  }
   0x2   :  { %v461_v1 = vld [vmem:[%s643_s1] sm:$0xff]   ;;  %406 = vmatprep.subr.bf16.mxu0 %v460_v0  ;;  %v463_v3 = vld [vmem:[%s643_s1 + $0x8] sm:$0xff]   ;;  %v465_v5 = vld [vmem:[%s643_s1 + $0x10] sm:$0xff]  }
   0x3   :  { %407 = vmatpush3.bf16.msra.mxu0 %v461_v1  ;;  %v466_v6 = vld [vmem:[%s643_s1 + $0x58] sm:$0xff]   ;;  %v468_v8 = vld [vmem:[%s643_s1 + $0x60] sm:$0xff]   ;;  %v470_v10 = vld [vmem:[%s643_s1 + $0x68] sm:$0xff]  }
   0x4   :  { %408 = vmatprep.subr.bf16.mxu0 %v462_v2  ;;  %v467_v7 = vld [vmem:[%s643_s1 + $0x18] sm:$0xff]   ;;  %v469_v9 = vld [vmem:[%s643_s1 + $0x20] sm:$0xff]   ;;  %v471_v12 = vld [vmem:[%s643_s1 + $0x28] sm:$0xff]  }
   0x5   :  { %v27_v11 = vld [vmem:[%s642_s0] sm:$0xff]  ;;  %v472_v14 = vld [vmem:[%s643_s1 + $0x70] sm:$0xff]  }
   0x6   :  { %v380_v13 = vcombine.high %v27_v11, %v27_v11 }
   0x7   :  { %409 = vmatpush3.bf16.msra.mxu0 %v463_v3 }
   0x8   :  { %410 = vmatprep.subr.bf16.mxu0 %v464_v4  ;;  %195 = vmatprep.mubr.bf16.mxu0 %v380_v13 }
   0xb   :  { %411 = vmatpush3.bf16.msra.mxu0 %v465_v5 }
   0xc   :  { %412 = vmatprep.subr.bf16.mxu0 %v466_v6 }
   0xf   :  { %413 = vmatpush3.bf16.msra.mxu0 %v467_v7 }
  0x10   :  { %414 = vmatprep.subr.bf16.mxu0 %v468_v8 }
  0x13   :  { %415 = vmatpush3.bf16.msra.mxu0 %v469_v9 }
  0x14   :  { %416 = vmatprep.subr.bf16.mxu0 %v470_v10 }
  0x15   :  { %10 = vsyncpa [#allocation3], 0  ;;  %v473_v15 = vld [vmem:[%s643_s1 + $0x30] sm:$0xff]   ;;  %v474_v16 = vld [vmem:[%s643_s1 + $0x78] sm:$0xff]   ;;  %v379_v18 = vcombine.low %v27_v11, %v27_v11  ;;  %v516_v20 = vmov 0.0   ;;  %vm517_vm0 = vmmov 0   ;;  %v224_v50 = vlaneseq }
  0x16   :  { %v475_v17 = vld [vmem:[%s643_s1 + $0x38] sm:$0xff]   ;;  %v478_v19 = vld [vmem:[%s645_s3] sm:$0xff]   ;;  %437 = vmatprep.subr.bf16.mxu1 %v516_v20  ;;  %v479_v21 = vld [vmem:[%s645_s3 + $0x8] sm:$0xff]   ;;  %453 = vmatprep.mubr.msk.bf16.mxu1 %vm517_vm0, %v516_v20 }
  0x17   :  { %417 = vmatpush3.bf16.msra.mxu0 %v471_v12  ;;  %438 = vmatpush3.bf16.msra.mxu1 %v478_v19  ;;  %v480_v22 = vld [vmem:[%s645_s3 + $0x10] sm:$0xff]   ;;  %v481_v23 = vld [vmem:[%s645_s3 + $0x18] sm:$0xff]   ;;  %v482_v24 = vld [vmem:[%s645_s3 + $0x20] sm:$0xff]   ;;  %v225_v51 = vshrl.u32 %v224_v50, 7 }
  0x18   :  { %418 = vmatprep.subr.bf16.mxu0 %v472_v14  ;;  %439 = vmatprep.subr.bf16.mxu1 %v516_v20  ;;  %v483_v25 = vld [vmem:[%s645_s3 + $0x28] sm:$0xff]   ;;  %v484_v26 = vld [vmem:[%s645_s3 + $0x30] sm:$0xff]   ;;  %v485_v27 = vld [vmem:[%s645_s3 + $0x38] sm:$0xff]  }
  0x19   :  { %v203_v52 = vld [vmem:[%s644_s2] sm:$0x3]  ;;  %v226_v53 = vsub.s32 0, %v225_v51  ;;  %v231_v54 = vsub.s32 1, %v225_v51  ;;  %s518_s2 = smov [#allocation2]  }
  0x1a   :  { %v405_v63 = vld [vmem:[%s646_s4] ss:$0 sm:$0xff]  ;;  %s371_s19 = sshll.u32 %s518_s2, 4  ;;  %s372_s19 = int_to_ptr.vmem [resolvable:$true] %s371_s19 }
  0x1b   :  { %419 = vmatpush3.bf16.msra.mxu0 %v473_v15  ;;  %440 = vmatpush3.bf16.msra.mxu1 %v479_v21  ;;  %v232_v58 = vrot.slane %v203_v52, %v231_v54  ;;  %s492_s4 = scalar_lea.vmem %s372_s19, 128  ;;  %p497_p1 = scmp.lt.s32.totalorder %s372_s19, %s372_s19 }
  0x1c   :  { %420 = vmatprep.subr.bf16.mxu0 %v474_v16  ;;  %441 = vmatprep.subr.bf16.mxu1 %v516_v20  ;;  %p493_p0 = scmp.ne.s32.totalorder %s372_s19, %s492_s4  ;;  %p498_p2 = scmp.lt.s32.totalorder %s492_s4, %s492_s4 }
  0x1e   :  { %p499_p3 = por %p498_p2, %p497_p1 }
  0x1f   :  { %421 = vmatpush3.bf16.msra.mxu0 %v475_v17  ;;  %442 = vmatpush3.bf16.msra.mxu1 %v480_v22 }
  0x20   :  { %443 = vmatprep.subr.bf16.mxu1 %v516_v20  ;;  %p500_p4 = pnand %p499_p3, %p493_p0 }
  0x22   :  { %196 = vmatmul.mubr.bf16.vlgmr.msra.gmra.mrb[0].mxu0 %v379_v18 }
  0x23   :  { %444 = vmatpush3.bf16.msra.mxu1 %v481_v23 }
  0x24   :  { %445 = vmatprep.subr.bf16.mxu1 %v516_v20 }
  0x27   :  { %446 = vmatpush3.bf16.msra.mxu1 %v482_v24 }
  0x28   :  { %447 = vmatprep.subr.bf16.mxu1 %v516_v20 }
  0x2b   :  { %448 = vmatpush3.bf16.msra.mxu1 %v483_v25 }
  0x2c   :  { %449 = vmatprep.subr.bf16.mxu1 %v516_v20 }
  0x2f   :  { %450 = vmatpush3.bf16.msra.mxu1 %v484_v26 }
  0x30   :  { %451 = vmatprep.subr.bf16.mxu1 %v516_v20 }
  0x33   :  { %452 = vmatpush3.bf16.msra.mxu1 %v485_v27 }
  0xf5   :  { %v422_v28 = vpop.f32.mrb[0].mxu0 }
  0xf6   :  { %v423_v29 = vpop.f32.mrb[1].mxu0 }
  0xf7   :  { %v424_v30 = vadd.f32 %v423_v29, %v422_v28  ;;  %v425_v31 = vpop.f32.mrb[2].mxu0 }
  0xf8   :  { %v426_v32 = vpop.f32.mrb[3].mxu0 }
  0xf9   :  { %v204_v33 = vrot.slane %v424_v30, 4 }
  0xfb   :  { %v205_v34 = vadd.f32 %v424_v30, %v204_v33 }
  0xfd   :  { %v206_v35 = vrot.slane %v205_v34, 2 }
  0xff   :  { %v207_v36 = vadd.f32 %v206_v35, %v205_v34 }
 0x101   :  { %v208_v37 = vrot.slane %v207_v36, 1 }
 0x103   :  { %v209_v38 = vadd.f32 %v208_v37, %v207_v36 }
 0x105   :  { %v211_v39 = vmul.f32 0.125, %v209_v38 }
 0x107   :  { %v212_v40 = vsub.f32 %v424_v30, %v211_v39 }
 0x109   :  { %v213_v41 = vmul.f32 %v212_v40, %v212_v40 }
 0x10b   :  { %v214_v42 = vrot.slane %v213_v41, 4 }
 0x10d   :  { %v215_v43 = vadd.f32 %v214_v42, %v213_v41 }
 0x10f   :  { %v216_v44 = vrot.slane %v215_v43, 2 }
 0x111   :  { %v217_v45 = vadd.f32 %v216_v44, %v215_v43 }
 0x113   :  { %v218_v46 = vrot.slane %v217_v45, 1 }
 0x115   :  { %v219_v47 = vadd.f32 %v218_v46, %v217_v45 }
 0x117   :  { %v220_v48 = vmul.f32 0.125, %v219_v47 }
 0x119   :  { %v221_v49 = vadd.f32 1e-05, %v220_v48 }
 0x11b   :  { %486 = vrsqrt.f32 %v221_v49 }
 0x125   :  { %v487_v55 = vpop.eup %486 }
 0x126   :  { %v223_v56 = vmul.f32 %v487_v55, %v203_v52 }
 0x128   :  { %v227_v57 = vrot.slane %v223_v56, %v226_v53 }
 0x12a   :  { %v228_v59 = vmul.f32 %v227_v57, %v212_v40 }
 0x12c   :  { %v233_v60 = vadd.f32 %v232_v58, %v228_v59 }
 0x12e   :  { %v235_v61 = vpack.c.bf16 %v233_v60, %v233_v60 }
 0x130   :  { %454 = vmatmul.mubr.bf16.vlgmr.msra.gmra.mrb[0].mxu1 %v235_v61 }
 0x203   :  { %v334_v62 = vpop.f32.mrb[0].mxu1 }
 0x204   :  { %v455_v0 = vpop.f32.mrb[1].mxu1  ;;  %v353_v3 = vadd.f32 %v405_v63, %v334_v62 }
 0x205   :  { %v337_v1 = vpop.f32.mrb[2].mxu1 }
 0x206   :  { %v456_v2 = vpop.f32.mrb[3].mxu1  ;;  %354 = vmax.xlane.f32.xlu0 %v353_v3 }
 0x293   :  { %v355_v4 = vpop.xlane.xlu0 %354 }
 0x294   :  { %v356_v5 = vsub.f32 %v353_v3, %v355_v4 }
 0x296   :  { %v357_v6 = vmul.f32 1.442695, %v356_v5 }
 0x298   :  { %488 = vpow2.f32 %v357_v6 }
 0x2a2   :  { %v489_v7 = vpop.eup %488 }
 0x2a3   :  { %359 = vadd.xlane.f32.xlu0 %v489_v7 }
 0x330   :  { %v360_v8 = vpop.xlane.xlu0 %359 }
 0x331   :  { %490 = vlog2.f32 %v360_v8 }
 0x33b   :  { %v491_v9 = vpop.eup %490 }
 0x33c   :  { %v362_v10 = vmul.f32 0.6931472, %v491_v9 }
 0x33e   :  { %v363_v11 = vsub.f32 %v356_v5, %v362_v10 }
 0x340   :  { %364 = vst [vmem:[#allocation2] sm:$0xff] %v363_v11 }
 0x341   :  { %503 = shalt.err (!%p500_p4)
}
 0x342   :  { %s504_s22 = scalar_lea.hbm %s647_s5, 128 }
 0x343   :  { %p505_p5 = scmp.ne.s32.totalorder %s647_s5, %s504_s22  ;;  %p508_p6 = scmp.lt.u32.totalorder %s504_s22, %s647_s5 }
 0x345   :  { %p510_p7 = pnand %p508_p6, %p505_p5 }
 0x347   :  { %513 = shalt.err (!%p510_p7)
}
 0x348   :  { %374 = dma.vmem_to_hbm [thread:$0]  %s372_s19, 128, %s647_s5, [#allocation3]  }
 0x349   :  { %514 = dma.done.wait [#allocation3], 128  }
 0x34a   :  { %515 = vsyncadd [#allocation3], 4294967168 }
 0x34b   :  { %378 = vsyncpa [#allocation3], 1 }

// kernel: mlp_forward.2
= control target key start
LH: loop header
LB: loop body
LE: loop exit
PB: predicated region body
PF: predicated region fallthrough
CT: control target
= control target key end

     0   :  { %8 = vsyncpa [#allocation3], 0  ;;  %s1224_s12 = smov [#allocation2]   ;;  %s1291_s0 = inlined_call_operand.vmem [shape: bf16[8,784], index: 0, kind: input, shape index: {}]   ;;  %s1292_s1 = inlined_call_operand.hbm [shape: bf16[784,256], index: 1, kind: input, shape index: {}]   ;;  %s1293_s2 = inlined_call_operand.vmem [shape: f32[2,256], index: 2, kind: input, shape index: {}]   ;;  %s1294_s3 = inlined_call_operand.vmem [shape: bf16[8,256], index: 3, kind: output, shape index: {}]  }
   0x1   :  { %s16_s13 = sshll.u32 %s1224_s12, 4  ;;  %s1200_s16 = scalar_lea.hbm %s1292_s1, 12544  ;;  %s17_s13 = int_to_ptr.vmem [resolvable:$true] %s16_s13 }
   0x2   :  { %p1201_p0 = scmp.ne.s32.totalorder %s1292_s1, %s1200_s16  ;;  %p1204_p1 = scmp.lt.u32.totalorder %s1200_s16, %s1292_s1 }
   0x4   :  { %p1206_p2 = pnand %p1204_p1, %p1201_p0 }
   0x6   :  { %1209 = shalt.err (!%p1206_p2)
}
   0x7   :  { %s1210_s21 = scalar_lea.vmem %s17_s13, 12544  ;;  %p1215_p4 = scmp.lt.s32.totalorder %s17_s13, %s17_s13 }
   0x8   :  { %p1211_p3 = scmp.ne.s32.totalorder %s17_s13, %s1210_s21  ;;  %p1216_p5 = scmp.lt.s32.totalorder %s1210_s21, %s1210_s21 }
   0xa   :  { %p1217_p6 = por %p1216_p5, %p1215_p4 }
   0xc   :  { %p1218_p7 = pnand %p1217_p6, %p1211_p3 }
   0xe   :  { %1221 = shalt.err (!%p1218_p7)
}
   0xf   :  { %s1225_s22 = smov 128   ;;  %s1226_s23 = smov 8  }
  0x10   :  { %22 = dma.hbm_to_vmem [thread:$0]  %s1292_s1, 12544, %s17_s13, [#allocation3], %s1225_s22, %s1225_s22, %s1226_s23  }
  0x11   :  { %1222 = dma.done.wait [#allocation3], 12544  }
  0x12   :  { %1223 = vsyncadd [#allocation3], 4294954752  ;;  %v1042_v0 = vld [vmem:[#allocation2 + $0x4] ss:$8 sps:$4 sm:$0xff]   ;;  %v1044_v1 = vld [vmem:[#allocation2] ss:$8 sps:$4 sm:$0xff]  }
  0x13   :  { %649 = vmatprep.subr.bf16.mxu1 %v1042_v0  ;;  %v1045_v2 = vld [vmem:[#allocation2 + $0x14] ss:$8 sps:$4 sm:$0xff]   ;;  %v1047_v3 = vld [vmem:[#allocation2 + $0x10] ss:$8 sps:$4 sm:$0xff]   ;;  %v1048_v4 = vld [vmem:[#allocation2 + $0x24] ss:$8 sps:$4 sm:$0xff]  }
  0x14   :  { %650 = vmatpush1.bf16.msra.mxu1 %v1044_v1  ;;  %v1050_v5 = vld [vmem:[#allocation2 + $0x20] ss:$8 sps:$4 sm:$0xff]   ;;  %v1051_v6 = vld [vmem:[#allocation2 + $0x34] ss:$8 sps:$4 sm:$0xff]   ;;  %v1053_v7 = vld [vmem:[#allocation2 + $0x30] ss:$8 sps:$4 sm:$0xff]  }
  0x15   :  { %651 = vmatprep.subr.bf16.mxu1 %v1045_v2  ;;  %v1054_v8 = vld [vmem:[#allocation2 + $0x44] ss:$8 sps:$4 sm:$0xff]   ;;  %v1074_v10 = vld [vmem:[#allocation2 + $0x200] ss:$8 sps:$4 sm:$0xff]   ;;  %v1057_v12 = vld [vmem:[#allocation2 + $0x54] ss:$8 sps:$4 sm:$0xff]  }
  0x16   :  { %v1072_v9 = vld [vmem:[#allocation2 + $0x204] ss:$8 sps:$4 sm:$0xff]   ;;  %v1056_v11 = vld [vmem:[#allocation2 + $0x40] ss:$8 sps:$4 sm:$0xff]   ;;  %v1078_v13 = vld [vmem:[#allocation2 + $0x214] ss:$8 sps:$4 sm:$0xff]  }
  0x17   :  { %731 = vmatprep.subr.bf16.mxu0 %v1072_v9  ;;  %v1080_v14 = vld [vmem:[#allocation2 + $0x210] ss:$8 sps:$4 sm:$0xff]   ;;  %v1084_v16 = vld [vmem:[#allocation2 + $0x224] ss:$8 sps:$4 sm:$0xff]   ;;  %v1086_v18 = vld [vmem:[#allocation2 + $0x220] ss:$8 sps:$4 sm:$0xff]  }
  0x18   :  { %652 = vmatpush1.bf16.msra.mxu1 %v1047_v3  ;;  %732 = vmatpush1.bf16.msra.mxu0 %v1074_v10  ;;  %v1059_v15 = vld [vmem:[#allocation2 + $0x50] ss:$8 sps:$4 sm:$0xff]   ;;  %v1060_v17 = vld [vmem:[#allocation2 + $0x64] ss:$8 sps:$4 sm:$0xff]   ;;  %v1090_v19 = vld [vmem:[#allocation2 + $0x234] ss:$8 sps:$4 sm:$0xff]  }
  0x19   :  { %653 = vmatprep.subr.bf16.mxu1 %v1048_v4  ;;  %733 = vmatprep.subr.bf16.mxu0 %v1078_v13  ;;  %v1062_v20 = vld [vmem:[#allocation2 + $0x60] ss:$8 sps:$4 sm:$0xff]   ;;  %v1063_v21 = vld [vmem:[#allocation2 + $0x74] ss:$8 sps:$4 sm:$0xff]   ;;  %v1092_v22 = vld [vmem:[#allocation2 + $0x230] ss:$8 sps:$4 sm:$0xff]  }
  0x1a   :  { %v1096_v23 = vld [vmem:[#allocation2 + $0x244] ss:$8 sps:$4 sm:$0xff]   ;;  %v1065_v24 = vld [vmem:[#allocation2 + $0x70] ss:$8 sps:$4 sm:$0xff]   ;;  %v1098_v26 = vld [vmem:[#allocation2 + $0x240] ss:$8 sps:$4 sm:$0xff]  }
  0x1b   :  { %v1066_v25 = vld [vmem:[#allocation2 + $0x84] ss:$8 sps:$4 sm:$0xff]   ;;  %v1102_v27 = vld [vmem:[#allocation2 + $0x254] ss:$8 sps:$4 sm:$0xff]   ;;  %v1068_v29 = vld [vmem:[#allocation2 + $0x80] ss:$8 sps:$4 sm:$0xff]  }
  0x1c   :  { %654 = vmatpush1.bf16.msra.mxu1 %v1050_v5  ;;  %734 = vmatpush1.bf16.msra.mxu0 %v1080_v14  ;;  %v1264_v28 = vld [vmem:[%s1291_s0] sm:$0xff]  ;;  %v1069_v31 = vld [vmem:[#allocation2 + $0x94] ss:$8 sps:$4 sm:$0xff]   ;;  %v1104_v32 = vld [vmem:[#allocation2 + $0x250] ss:$8 sps:$4 sm:$0xff]   ;;  %vm645_vm0 = vcmask 130048  }
  0x1d   :  { %655 = vmatprep.subr.bf16.mxu1 %v1051_v6  ;;  %735 = vmatprep.subr.bf16.mxu0 %v1084_v16  ;;  %v920_v30 = vcombine.high %v1264_v28, %v1264_v28  ;;  %v1108_v33 = vld [vmem:[#allocation2 + $0x264] ss:$8 sps:$4 sm:$0xff]   ;;  %v1071_v34 = vld [vmem:[#allocation2 + $0x90] ss:$8 sps:$4 sm:$0xff]   ;;  %v1110_v36 = vld [vmem:[#allocation2 + $0x260] ss:$8 sps:$4 sm:$0xff]   ;;  %v919_v63 = vcombine.low %v1264_v28, %v1264_v28 }
  0x1e   :  { %v1075_v35 = vld [vmem:[#allocation2 + $0xa4] ss:$8 sps:$4 sm:$0xff]   ;;  %v1116_v37 = vld [vmem:[#allocation2 + $0x274] ss:$8 sps:$4 sm:$0xff]   ;;  %v1077_v38 = vld [vmem:[#allocation2 + $0xa0] ss:$8 sps:$4 sm:$0xff]  }
  0x1f   :  { %681 = vmatprep.mubr.bf16.mxu1 %v920_v30  ;;  %v1081_v39 = vld [vmem:[#allocation2 + $0xb4] ss:$8 sps:$4 sm:$0xff]   ;;  %v1118_v40 = vld [vmem:[#allocation2 + $0x270] ss:$8 sps:$4 sm:$0xff]   ;;  %v1122_v41 = vld [vmem:[#allocation2 + $0x284] ss:$8 sps:$4 sm:$0xff]  }
  0x20   :  { %656 = vmatpush1.bf16.msra.mxu1 %v1053_v7  ;;  %736 = vmatpush1.bf16.msra.mxu0 %v1086_v18  ;;  %v1083_v42 = vld [vmem:[#allocation2 + $0xb0] ss:$8 sps:$4 sm:$0xff]   ;;  %v1087_v43 = vld [vmem:[#allocation2 + $0xc4] ss:$8 sps:$4 sm:$0xff]   ;;  %v1124_v44 = vld [vmem:[#allocation2 + $0x280] ss:$8 sps:$4 sm:$0xff]  }
  0x21   :  { %657 = vmatprep.subr.bf16.mxu1 %v1054_v8  ;;  %737 = vmatprep.subr.bf16.mxu0 %v1090_v19  ;;  %v1128_v45 = vld [vmem:[#allocation2 + $0x294] ss:$8 sps:$4 sm:$0xff]   ;;  %v1089_v46 = vld [vmem:[#allocation2 + $0xc0] ss:$8 sps:$4 sm:$0xff]   ;;  %v1130_v48 = vld [vmem:[#allocation2 + $0x290] ss:$8 sps:$4 sm:$0xff]  }
  0x22   :  { %v1093_v47 = vld [vmem:[#allocation2 + $0xd4] ss:$8 sps:$4 sm:$0xff]   ;;  %v1134_v49 = vld [vmem:[#allocation2 + $0x2a4] ss:$8 sps:$4 sm:$0xff]   ;;  %v1095_v50 = vld [vmem:[#allocation2 + $0xd0] ss:$8 sps:$4 sm:$0xff]  }
  0x23   :  { %v1099_v51 = vld [vmem:[#allocation2 + $0xe4] ss:$8 sps:$4 sm:$0xff]   ;;  %v1136_v52 = vld [vmem:[#allocation2 + $0x2a0] ss:$8 sps:$4 sm:$0xff]   ;;  %v1140_v53 = vld [vmem:[#allocation2 + $0x2b4] ss:$8 sps:$4 sm:$0xff]  }
  0x24   :  { %658 = vmatpush1.bf16.msra.mxu1 %v1056_v11  ;;  %738 = vmatpush1.bf16.msra.mxu0 %v1092_v22  ;;  %v1101_v54 = vld [vmem:[#allocation2 + $0xe0] ss:$8 sps:$4 sm:$0xff]   ;;  %v1105_v55 = vld [vmem:[#allocation2 + $0xf4] ss:$8 sps:$4 sm:$0xff]   ;;  %v1142_v57 = vld [vmem:[#allocation2 + $0x2b0] ss:$8 sps:$4 sm:$0xff]  }
  0x25   :  { %659 = vmatprep.subr.bf16.mxu1 %v1057_v12  ;;  %739 = vmatprep.subr.bf16.mxu0 %v1096_v23  ;;  %v31_v56 = vld [vmem:[%s1291_s0 + $0x10] sm:$0xff]  ;;  %v1146_v59 = vld [vmem:[#allocation2 + $0x2c4] ss:$8 sps:$4 sm:$0xff]   ;;  %v1148_v62 = vld [vmem:[#allocation2 + $0x2c0] ss:$8 sps:$4 sm:$0xff]  }
  0x26   :  { %v924_v58 = vcombine.high %v31_v56, %v31_v56  ;;  %v1107_v60 = vld [vmem:[#allocation2 + $0xf0] ss:$8 sps:$4 sm:$0xff]   ;;  %v1115_v61 = vld [vmem:[#allocation2 + $0x104] ss:$8 sps:$4 sm:$0xff]   ;;  %v1152_v0 = vld [vmem:[#allocation2 + $0x2d4] ss:$8 sps:$4 sm:$0xff]  }
  0x27   :  { %v1113_v1 = vld [vmem:[#allocation2 + $0x100] ss:$8 sps:$4 sm:$0xff]   ;;  %v1121_v2 = vld [vmem:[#allocation2 + $0x114] ss:$8 sps:$4 sm:$0xff]   ;;  %v1154_v3 = vld [vmem:[#allocation2 + $0x2d0] ss:$8 sps:$4 sm:$0xff]  }
  0x28   :  { %660 = vmatpush1.bf16.msra.mxu1 %v1059_v15  ;;  %740 = vmatpush1.bf16.msra.mxu0 %v1098_v26  ;;  %v1158_v4 = vld [vmem:[#allocation2 + $0x2e4] ss:$8 sps:$4 sm:$0xff]   ;;  %v1119_v6 = vld [vmem:[#allocation2 + $0x110] ss:$8 sps:$4 sm:$0xff]   ;;  %v1160_v9 = vld [vmem:[#allocation2 + $0x2e0] ss:$8 sps:$4 sm:$0xff]  }
  0x29   :  { %661 = vmatprep.subr.bf16.mxu1 %v1060_v17  ;;  %741 = vmatprep.subr.bf16.mxu0 %v1102_v27  ;;  %v1276_v5 = vld [vmem:[%s1291_s0 + $0x8] sm:$0xff]  ;;  %v1164_v10 = vld [vmem:[#allocation2 + $0x2f4] ss:$8 sps:$4 sm:$0xff]   ;;  %v1166_v13 = vld [vmem:[#allocation2 + $0x2f0] ss:$8 sps:$4 sm:$0xff]   ;;  %v923_v17 = vcombine.low %v31_v56, %v31_v56 }
  0x2a   :  { %763 = vmatprep.mubr.bf16.mxu0 %v924_v58  ;;  %v922_v7 = vcombine.high %v1276_v5, %v1276_v5  ;;  %v1127_v8 = vld [vmem:[#allocation2 + $0x124] ss:$8 sps:$4 sm:$0xff]   ;;  %v1125_v11 = vld [vmem:[#allocation2 + $0x120] ss:$8 sps:$4 sm:$0xff]   ;;  %v1133_v12 = vld [vmem:[#allocation2 + $0x134] ss:$8 sps:$4 sm:$0xff]  }
  0x2b   :  { %v1180_v14 = vld [vmem:[#allocation2 + $0x304] ss:$8 sps:$4 sm:$0xff]   ;;  %v1131_v15 = vld [vmem:[#allocation2 + $0x130] ss:$8 sps:$4 sm:$0xff]   ;;  %v1178_v18 = vld [vmem:[#allocation2 + $0x300] ss:$8 sps:$4 sm:$0xff]  }
  0x2c   :  { %662 = vmatpush1.bf16.msra.mxu1 %v1062_v20  ;;  %742 = vmatpush1.bf16.msra.mxu0 %v1104_v32  ;;  %v1139_v16 = vld [vmem:[#allocation2 + $0x144] ss:$8 sps:$4 sm:$0xff]   ;;  %v1137_v19 = vld [vmem:[#allocation2 + $0x140] ss:$8 sps:$4 sm:$0xff]   ;;  %v1145_v20 = vld [vmem:[#allocation2 + $0x154] ss:$8 sps:$4 sm:$0xff]  }
  0x2d   :  { %663 = vmatprep.subr.bf16.mxu1 %v1063_v21  ;;  %743 = vmatprep.subr.bf16.mxu0 %v1108_v33  ;;  %v1227_v21 = vmov 0   ;;  %v1143_v22 = vld [vmem:[#allocation2 + $0x150] ss:$8 sps:$4 sm:$0xff]   ;;  %v1151_v23 = vld [vmem:[#allocation2 + $0x164] ss:$8 sps:$4 sm:$0xff]  }
  0x2e   :  { %v1184_v26 = vld [vmem:[%s1291_s0 + $0x18] ss:$0 sps:$4 sm:$0xff]   ;;  %v1163_v28 = vld [vmem:[#allocation2 + $0x184] ss:$8 sps:$4 sm:$0xff]   ;;  %v1169_v30 = vld [vmem:[#allocation2 + $0x194] ss:$8 sps:$4 sm:$0xff]  }
  0x2f   :  { %v1155_v27 = vld [vmem:[#allocation2 + $0x170] ss:$8 sps:$4 sm:$0xff]   ;;  %v1174_v32 = vld [vmem:[#allocation2 + $0x1a4] ss:$8 sps:$4 sm:$0xff]   ;;  %v1172_v33 = vld [vmem:[#allocation2 + $0x1a0] ss:$8 sps:$4 sm:$0xff]  }
  0x30   :  { %664 = vmatpush1.bf16.msra.mxu1 %v1065_v24  ;;  %744 = vmatpush1.bf16.msra.mxu0 %v1110_v36  ;;  %v1149_v24 = vld [vmem:[#allocation2 + $0x160] ss:$8 sps:$4 sm:$0xff]   ;;  %v1183_v36 = vld [vmem:[#allocation2 + $0x1c4] ss:$8 sps:$4 sm:$0xff]  }
  0x31   :  { %665 = vmatprep.subr.bf16.mxu1 %v1066_v25  ;;  %745 = vmatprep.subr.bf16.mxu0 %v1116_v37  ;;  %v1157_v25 = vld [vmem:[#allocation2 + $0x174] ss:$8 sps:$4 sm:$0xff]   ;;  %v1181_v37 = vld [vmem:[#allocation2 + $0x1c0] ss:$8 sps:$4 sm:$0xff]  }
  0x34   :  { %666 = vmatpush1.bf16.msra.mxu1 %v1068_v29  ;;  %746 = vmatpush1.bf16.msra.mxu0 %v1118_v40  ;;  %v1161_v29 = vld [vmem:[#allocation2 + $0x180] ss:$8 sps:$4 sm:$0xff]   ;;  %v1190_v40 = vld [vmem:[#allocation2 + $0x1e4] ss:$8 sps:$4 sm:$0xff]  }
  0x35   :  { %667 = vmatprep.subr.bf16.mxu1 %v1069_v31  ;;  %747 = vmatprep.subr.bf16.mxu0 %v1122_v41  ;;  %v1167_v31 = vld [vmem:[#allocation2 + $0x190] ss:$8 sps:$4 sm:$0xff]   ;;  %v1188_v41 = vld [vmem:[#allocation2 + $0x1e0] ss:$8 sps:$4 sm:$0xff]  }
  0x38   :  { %668 = vmatpush1.bf16.msra.mxu1 %v1071_v34  ;;  %748 = vmatpush1.bf16.msra.mxu0 %v1124_v44  ;;  %v1177_v34 = vld [vmem:[#allocation2 + $0x1b4] ss:$8 sps:$4 sm:$0xff]   ;;  %v921_v44 = vcombine.low %v1276_v5, %v1276_v5 }
  0x39   :  { %669 = vmatprep.subr.bf16.mxu1 %v1075_v35  ;;  %749 = vmatprep.subr.bf16.mxu0 %v1128_v45  ;;  %v1175_v35 = vld [vmem:[#allocation2 + $0x1b0] ss:$8 sps:$4 sm:$0xff]  }
  0x3c   :  { %670 = vmatpush1.bf16.msra.mxu1 %v1077_v38  ;;  %750 = vmatpush1.bf16.msra.mxu0 %v1130_v48  ;;  %v1187_v38 = vld [vmem:[#allocation2 + $0x1d4] ss:$8 sps:$4 sm:$0xff]  }
  0x3d   :  { %671 = vmatprep.subr.bf16.mxu1 %v1081_v39  ;;  %751 = vmatprep.subr.bf16.mxu0 %v1134_v49  ;;  %v1185_v39 = vld [vmem:[#allocation2 + $0x1d0] ss:$8 sps:$4 sm:$0xff]  }
  0x40   :  { %672 = vmatpush1.bf16.msra.mxu1 %v1083_v42  ;;  %752 = vmatpush1.bf16.msra.mxu0 %v1136_v52  ;;  %v1193_v42 = vld [vmem:[#allocation2 + $0x1f4] ss:$8 sps:$4 sm:$0xff]  }
  0x41   :  { %673 = vmatprep.subr.bf16.mxu1 %v1087_v43  ;;  %753 = vmatprep.subr.bf16.mxu0 %v1140_v53  ;;  %v1191_v43 = vld [vmem:[#allocation2 + $0x1f0] ss:$8 sps:$4 sm:$0xff]  }
  0x44   :  { %674 = vmatpush1.bf16.msra.mxu1 %v1089_v46  ;;  %754 = vmatpush1.bf16.msra.mxu0 %v1142_v57 }
  0x45   :  { %675 = vmatprep.subr.bf16.mxu1 %v1093_v47  ;;  %755 = vmatprep.subr.bf16.mxu0 %v1146_v59 }
  0x48   :  { %676 = vmatpush1.bf16.msra.mxu1 %v1095_v50  ;;  %756 = vmatpush1.bf16.msra.mxu0 %v1148_v62 }
  0x49   :  { %677 = vmatprep.subr.bf16.mxu1 %v1099_v51  ;;  %757 = vmatprep.subr.bf16.mxu0 %v1152_v0 }
  0x4c   :  { %678 = vmatpush1.bf16.msra.mxu1 %v1101_v54  ;;  %758 = vmatpush1.bf16.msra.mxu0 %v1154_v3 }
  0x4d   :  { %679 = vmatprep.subr.bf16.mxu1 %v1105_v55  ;;  %759 = vmatprep.subr.bf16.mxu0 %v1158_v4 }
  0x50   :  { %680 = vmatpush1.bf16.msra.mxu1 %v1107_v60  ;;  %760 = vmatpush1.bf16.msra.mxu0 %v1160_v9 }
  0x51   :  { %690 = vmatprep.subr.bf16.mxu1 %v1115_v61  ;;  %761 = vmatprep.subr.bf16.mxu0 %v1164_v10 }
  0x53   :  { %682 = vmatmul.mubr.bf16.vlgmr.msra.gmra.mrb[0].mxu1 %v919_v63 }
  0x54   :  { %691 = vmatpush1.bf16.msra.mxu1 %v1113_v1  ;;  %722 = vmatprep.mubr.bf16.mxu1 %v922_v7 }
  0x55   :  { %692 = vmatprep.subr.bf16.mxu1 %v1121_v2  ;;  %762 = vmatpush1.bf16.msra.mxu0 %v1166_v13 }
  0x56   :  { %772 = vmatprep.subr.bf16.mxu0 %v1180_v14 }
  0x58   :  { %693 = vmatpush1.bf16.msra.mxu1 %v1119_v6  ;;  %764 = vmatmul.mubr.bf16.vlgmr.msra.gmra.mrb[0].mxu0 %v923_v17 }
  0x59   :  { %694 = vmatprep.subr.bf16.mxu1 %v1127_v8  ;;  %773 = vmatpush1.bf16.msra.mxu0 %v1178_v18 }
  0x5a   :  { %804 = vmatprep.mubr.bf16.mxu0 %v1227_v21 }
  0x5c   :  { %695 = vmatpush1.bf16.msra.mxu1 %v1125_v11 }
  0x5d   :  { %696 = vmatprep.subr.bf16.mxu1 %v1133_v12 }
  0x60   :  { %697 = vmatpush1.bf16.msra.mxu1 %v1131_v15 }
  0x61   :  { %698 = vmatprep.subr.bf16.mxu1 %v1139_v16 }
  0x64   :  { %699 = vmatpush1.bf16.msra.mxu1 %v1137_v19  ;;  %1024 = vmatmul.mubr.msk.bf16.vlgmr.msra.gmra.mrb[0].mxu0 %vm645_vm0, %v1184_v26 }
  0x65   :  { %700 = vmatprep.subr.bf16.mxu1 %v1145_v20 }
  0x68   :  { %701 = vmatpush1.bf16.msra.mxu1 %v1143_v22 }
  0x69   :  { %702 = vmatprep.subr.bf16.mxu1 %v1151_v23 }
  0x6c   :  { %703 = vmatpush1.bf16.msra.mxu1 %v1149_v24 }
  0x6d   :  { %704 = vmatprep.subr.bf16.mxu1 %v1157_v25  ;;  %v1228_v25 = vmov 1983009808  }
  0x6e   :  { %v855_v26 = vunpack.c.l.s4 %v1228_v25 }
  0x70   :  { %705 = vmatpush1.bf16.msra.mxu1 %v1155_v27  ;;  %v857_v27 = vlaneseq }
  0x71   :  { %706 = vmatprep.subr.bf16.mxu1 %v1163_v28  ;;  %v856_v28 = vunpack.c.0.s8 %v855_v26 }
  0x74   :  { %707 = vmatpush1.bf16.msra.mxu1 %v1161_v29  ;;  %v858_v29 = vshrl.u32 %v857_v27, 7 }
  0x75   :  { %708 = vmatprep.subr.bf16.mxu1 %v1169_v30 }
  0x78   :  { %709 = vmatpush1.bf16.msra.mxu1 %v1167_v31  ;;  %v859_v31 = vsub.s32 %v856_v28, %v858_v29 }
  0x79   :  { %710 = vmatprep.subr.bf16.mxu1 %v1174_v32 }
  0x7c   :  { %711 = vmatpush1.bf16.msra.mxu1 %v1172_v33 }
  0x7d   :  { %712 = vmatprep.subr.bf16.mxu1 %v1177_v34  ;;  %v887_v34 = vsub.s32 1, %v858_v29 }
  0x80   :  { %713 = vmatpush1.bf16.msra.mxu1 %v1175_v35  ;;  %v891_v35 = vsub.s32 3, %v858_v29 }
  0x81   :  { %714 = vmatprep.subr.bf16.mxu1 %v1183_v36  ;;  %v813_v36 = vld [vmem:[%s1293_s2] sm:$0xf] }
  0x84   :  { %715 = vmatpush1.bf16.msra.mxu1 %v1181_v37 }
  0x85   :  { %716 = vmatprep.subr.bf16.mxu1 %v1187_v38  ;;  %v866_v38 = vsub.s32 0, %v858_v29 }
  0x88   :  { %717 = vmatpush1.bf16.msra.mxu1 %v1185_v39  ;;  %v870_v39 = vsub.s32 2, %v858_v29 }
  0x89   :  { %718 = vmatprep.subr.bf16.mxu1 %v1190_v40 }
  0x8c   :  { %719 = vmatpush1.bf16.msra.mxu1 %v1188_v41  ;;  %v888_v41 = vrot.slane %v813_v36, %v887_v34 }
  0x8d   :  { %720 = vmatprep.subr.bf16.mxu1 %v1193_v42  ;;  %v892_v42 = vrot.slane %v813_v36, %v891_v35 }
  0x90   :  { %721 = vmatpush1.bf16.msra.mxu1 %v1191_v43 }
  0x93   :  { %723 = vmatmul.mubr.bf16.vlgmr.msra.gmra.mrb[0].mxu1 %v921_v44 }
 0x137   :  { %v806_v45 = vpop.f32.mrb[0].mxu0 }
 0x138   :  { %v808_v46 = vpop.f32.mrb[1].mxu0 }
 0x139   :  { %v810_v47 = vpop.f32.mrb[2].mxu0 }
 0x13a   :  { %v811_v48 = vpop.f32.mrb[3].mxu0  ;;  %v898_v47 = vrot.slane %v888_v41, %v887_v34 }
 0x13b   :  { %v902_v48 = vrot.slane %v892_v42, %v887_v34 }
 0x166   :  { %v724_v49 = vpop.f32.mrb[0].mxu1 }
 0x167   :  { %v1027_v50 = vadd.f32 %v806_v45, %v724_v49  ;;  %v726_v51 = vpop.f32.mrb[1].mxu1 }
 0x168   :  { %v1028_v52 = vadd.f32 %v808_v46, %v726_v51  ;;  %v728_v53 = vpop.f32.mrb[2].mxu1 }
 0x169   :  { %v814_v54 = vrot.slane %v1027_v50, 4  ;;  %v729_v55 = vpop.f32.mrb[3].mxu1 }
 0x16a   :  { %v820_v56 = vrot.slane %v1028_v52, 4 }
 0x16b   :  { %v815_v57 = vadd.f32 %v1027_v50, %v814_v54 }
 0x16c   :  { %v821_v58 = vadd.f32 %v1028_v52, %v820_v56 }
 0x16d   :  { %v816_v59 = vrot.slane %v815_v57, 2 }
 0x16e   :  { %v822_v60 = vrot.slane %v821_v58, 2 }
 0x16f   :  { %v817_v61 = vadd.f32 %v816_v59, %v815_v57 }
 0x170   :  { %v823_v62 = vadd.f32 %v822_v60, %v821_v58 }
 0x171   :  { %v818_v63 = vrot.slane %v817_v61, 1 }
 0x172   :  { %v824_v0 = vrot.slane %v823_v62, 1 }
 0x173   :  { %v819_v1 = vadd.f32 %v818_v63, %v817_v61 }
 0x174   :  { %v825_v2 = vadd.f32 %v824_v0, %v823_v62 }
 0x175   :  { %v827_v3 = vmul.f32 0.125, %v819_v1 }
 0x176   :  { %v828_v4 = vmul.f32 0.125, %v825_v2 }
 0x177   :  { %v829_v5 = vsub.f32 %v1027_v50, %v827_v3 }
 0x178   :  { %v830_v6 = vsub.f32 %v1028_v52, %v828_v4 }
 0x179   :  { %v831_v7 = vmul.f32 %v829_v5, %v829_v5 }
 0x17a   :  { %v832_v8 = vmul.f32 %v830_v6, %v830_v6 }
 0x17b   :  { %v833_v9 = vrot.slane %v831_v7, 4 }
 0x17c   :  { %v839_v10 = vrot.slane %v832_v8, 4 }
 0x17d   :  { %v834_v11 = vadd.f32 %v833_v9, %v831_v7 }
 0x17e   :  { %v840_v12 = vadd.f32 %v839_v10, %v832_v8 }
 0x17f   :  { %v835_v13 = vrot.slane %v834_v11, 2 }
 0x180   :  { %v841_v14 = vrot.slane %v840_v12, 2 }
 0x181   :  { %v836_v15 = vadd.f32 %v835_v13, %v834_v11 }
 0x182   :  { %v842_v16 = vadd.f32 %v841_v14, %v840_v12 }
 0x183   :  { %v837_v17 = vrot.slane %v836_v15, 1 }
 0x184   :  { %v843_v18 = vrot.slane %v842_v16, 1 }
 0x185   :  { %v838_v19 = vadd.f32 %v837_v17, %v836_v15 }
 0x186   :  { %v844_v20 = vadd.f32 %v843_v18, %v842_v16 }
 0x187   :  { %v845_v21 = vmul.f32 0.125, %v838_v19 }
 0x188   :  { %v846_v22 = vmul.f32 0.125, %v844_v20 }
 0x189   :  { %v847_v23 = vadd.f32 1e-05, %v845_v21 }
 0x18a   :  { %v848_v24 = vadd.f32 1e-05, %v846_v22 }
 0x18b   :  { %1196 = vrsqrt.f32 %v847_v23 }
 0x18c   :  { %1198 = vrsqrt.f32 %v848_v24 }
 0x195   :  { %v1197_v30 = vpop.eup %1196 }
 0x196   :  { %v1199_v32 = vpop.eup %1198 }
 0x197   :  { %v853_v33 = vcombine.low %v1197_v30, %v1199_v32 }
 0x199   :  { %v860_v37 = vrot.slane %v853_v33, %v859_v31 }
 0x19b   :  { %v862_v40 = vmul.f32 %v860_v37, %v813_v36 }
 0x19d   :  { %v867_v43 = vrot.slane %v862_v40, %v866_v38  ;;  %v871_v44 = vrot.slane %v862_v40, %v870_v39 }
 0x19f   :  { %v877_v45 = vrot.slane %v867_v43, %v866_v38  ;;  %v881_v46 = vrot.slane %v871_v44, %v866_v38 }
 0x1a1   :  { %v882_v49 = vmul.f32 %v877_v45, %v829_v5  ;;  %v883_v50 = vmul.f32 %v881_v46, %v830_v6 }
 0x1a3   :  { %v903_v51 = vadd.f32 %v898_v47, %v882_v49  ;;  %v904_v52 = vadd.f32 %v902_v48, %v883_v50 }
 0x1a5   :  { %v1026_v53 = vpack.c.bf16 %v904_v52, %v903_v51 }
 0x1a7   :  { %913 = vst [vmem:[%s1294_s3] sm:$0xff] %v1026_v53 }
 0x1a8   :  { %918 = vsyncpa [#allocation3], 1 }

</bundles_post_ra>
